<compile_context>
chip_gen: v6e
topology: v6e:2x2x1
jax: 0.10.0
libtpu: 0.0.40
codegen_flags: <defaults>
</compile_context>

<pallas_src>
import functools

import jax
import jax.numpy as jnp
from jax.experimental import pallas as pl
from jax.experimental.pallas import tpu as pltpu


# ------------------------- Pass 1: global average pool -----------------------

def _pool_kernel(x_ref, mean_ref, acc_ref, *, inv_hw, lane_unroll_cap=64):
    # x_ref:    (rt, hwt) tile of the flattened (B*C, HW[_padded]) input.
    # mean_ref: (rt, 1) output, resident across the HW ('arbitrary') axis.
    # acc_ref:  (rt, 128) lane-dense f32 accumulator scratch.
    rt, hwt = x_ref.shape
    n_groups, rem = divmod(hwt, 128)
    h = pl.program_id(1)
    last = pl.num_programs(1) - 1

    if rem == 0 and n_groups <= lane_unroll_cap:
        # Lane-dense accumulation: per step only full-width VALU adds into the
        # (rt, 128) scratch; the cross-lane (XLU) reduce and the narrow (rt, 1)
        # store happen exactly once, in the finalize.
        @pl.when(h == 0)
        def _():
            acc_ref[...] = jnp.zeros_like(acc_ref)

        part = x_ref[:, 0:128].astype(jnp.float32)
        for j in range(1, n_groups):
            part = part + x_ref[:, j * 128:(j + 1) * 128].astype(jnp.float32)
        acc_ref[...] += part

        @pl.when(h == last)
        def _():
            mean_ref[...] = jnp.sum(acc_ref[...], axis=-1, keepdims=True) * inv_hw
    else:
        # Very wide tiles (or hwt not a multiple of 128, which only happens when
        # hwt == HW, i.e. a single step): plain row reduction. Per-step narrow
        # stores are negligible relative to the multi-MiB block DMA here.
        @pl.when(h == 0)
        def _():
            mean_ref[...] = jnp.zeros_like(mean_ref)

        mean_ref[...] += jnp.sum(x_ref[...].astype(jnp.float32), axis=-1,
                                 keepdims=True)

        @pl.when(h == last)
        def _():
            mean_ref[...] *= inv_hw


# ------------- Pass 2: gate = sigmoid(W2 @ prelu(W1 @ mean + b1) + b2) -------

def _gate_kernel(alpha_ref, mean_ref, w1t_ref, b1_ref, w2t_ref, b2_ref, g_ref):
    y = mean_ref[...]                                                   # (B, C)
    h = jnp.dot(y, w1t_ref[...], preferred_element_type=jnp.float32) + b1_ref[...]
    alpha = alpha_ref[0]                                                # SMEM scalar
    h = jnp.where(h >= 0, h, alpha * h)                                 # PReLU
    s = jnp.dot(h, w2t_ref[...], preferred_element_type=jnp.float32) + b2_ref[...]
    g_ref[...] = jax.nn.sigmoid(s)                                      # (B, C)


# ----------------------- Pass 3: per-channel elementwise scale ---------------

def _scale_kernel(x_ref, g_ref, o_ref):
    # x_ref: (rt, hwt), g_ref: (rt, 1) broadcast over the lane axis.
    o_ref[...] = (x_ref[...].astype(jnp.float32) * g_ref[...]).astype(o_ref.dtype)


# ------------------------------- tiling helpers -------------------------------

def _vmem_limit_bytes():
    """Generation-aware scoped-VMEM limit (75% of physical, conservative fallback)."""
    cap = 0
    try:
        cap = int(getattr(pltpu.get_tpu_info(), "vmem_capacity_bytes", 0) or 0)
    except Exception:
        cap = 0
    if cap <= 0:
        cap = 64 * 1024 * 1024          # v7x physical — safe on every generation
    limit = min((cap * 3) // 4, 100 * 1024 * 1024)
    return max(limit, 32 * 1024 * 1024)


def _plan_tiles(n_rows, n_cols, itemsize, budget_bytes, row_align, row_cap=1024):
    """Pick (row_tile, col_tile) with footprint <= budget_bytes.

    Lane (last) dim first: take the full extent if it fits alongside at least
    `row_align` rows, otherwise the largest 128-aligned tile within the budget.
    Rows soak up the remaining budget, clamped so the row axis keeps >= 2 grid
    steps (megacore) whenever n_rows allows it. Tiles need not divide the array
    (callers use pl.cdiv grids; ragged rows are handled by Pallas write-clamping).
    """
    budget_elems = max(budget_bytes // itemsize, row_align * 128)
    max_ct = max(128, (budget_elems // row_align) // 128 * 128)
    ct = n_cols if n_cols <= max_ct else max_ct

    rt = max(1, budget_elems // ct)
    rt = min(rt, row_cap, n_rows)
    if n_rows >= 2 * row_align:                  # leave work for both TensorCores
        rt = min(rt, (n_rows + 1) // 2)
    if rt < n_rows:                              # blocked rows must be sublane-aligned
        rt = max(row_align, (rt // row_align) * row_align)
        rt = min(rt, n_rows)
    return rt, ct


# ------------------------------- wrapper --------------------------------------

def ca_layer(x, w1, b1, alpha, w2, b2):
    """x: (B, C, H, W); w1: (Cr, C); b1: (Cr,); alpha: scalar; w2: (C, Cr); b2: (C,)."""
    B, C, H, W = x.shape
    Cr = w1.shape[0]
    HW = H * W
    R = B * C

    x2 = x.reshape(R, HW)

    itemsize = x.dtype.itemsize
    row_align = max(8, 32 // max(itemsize, 1))     # 8 f32, 16 bf16, 32 int8
    vmem_limit = _vmem_limit_bytes()

    # ---- Pass 1: per-(batch, channel) mean over HW -------------------------
    # Input is double-buffered; output/scratch are tiny -> budget = limit/4.
    rt_p, hwt_p = _plan_tiles(R, HW, itemsize, vmem_limit // 4, row_align)
    n_hw = pl.cdiv(HW, hwt_p)
    if n_hw > 1 and HW % hwt_p != 0:
        # Rare (only when HW exceeds the block budget AND has an awkward tail):
        # zero-pad once so every hw step is full; zeros don't perturb the sum.
        x_pool = jnp.pad(x2, ((0, 0), (0, n_hw * hwt_p - HW)))
    else:
        x_pool = x2

    means = pl.pallas_call(
        functools.partial(_pool_kernel, inv_hw=1.0 / HW),
        out_shape=jax.ShapeDtypeStruct((R, 1), jnp.float32),
        grid_spec=pltpu.PrefetchScalarGridSpec(
            num_scalar_prefetch=0,
            grid=(pl.cdiv(R, rt_p), n_hw),
            in_specs=[pl.BlockSpec((rt_p, hwt_p), lambda r, h: (r, h))],
            out_specs=pl.BlockSpec((rt_p, 1), lambda r, h: (r, 0)),
            scratch_shapes=[pltpu.VMEM((rt_p, 128), jnp.float32)],
        ),
        compiler_params=pltpu.CompilerParams(
            dimension_semantics=("parallel", "arbitrary"),
            vmem_limit_bytes=vmem_limit,
        ),
    )(x_pool)

    # ---- Pass 2: gate for all B at once (single tiny kernel, no grid) ------
    vmem_spec = pl.BlockSpec(memory_space=pltpu.MemorySpace.VMEM)
    smem_spec = pl.BlockSpec(memory_space=pltpu.MemorySpace.SMEM)
    gate = pl.pallas_call(
        _gate_kernel,
        out_shape=jax.ShapeDtypeStruct((B, C), jnp.float32),
        in_specs=[smem_spec, vmem_spec, vmem_spec, vmem_spec, vmem_spec, vmem_spec],
        out_specs=vmem_spec,
    )(
        jnp.reshape(alpha, (1,)).astype(jnp.float32),
        means.reshape(B, C),
        w1.T.astype(jnp.float32),              # (C, Cr)
        b1.reshape(1, Cr).astype(jnp.float32),
        w2.T.astype(jnp.float32),              # (Cr, C)
        b2.reshape(1, C).astype(jnp.float32),
    )

    # ---- Pass 3: x * gate (streaming, lane-dense, both axes parallel) ------
    # x in + out, each double-buffered -> budget = limit/6 per block.
    rt_s, hwt_s = _plan_tiles(R, HW, itemsize, vmem_limit // 6, row_align)
    out2 = pl.pallas_call(
        _scale_kernel,
        out_shape=jax.ShapeDtypeStruct((R, HW), x.dtype),
        grid_spec=pltpu.PrefetchScalarGridSpec(
            num_scalar_prefetch=0,
            grid=(pl.cdiv(R, rt_s), pl.cdiv(HW, hwt_s)),
            in_specs=[
                pl.BlockSpec((rt_s, hwt_s), lambda r, h: (r, h)),
                pl.BlockSpec((rt_s, 1), lambda r, h: (r, 0)),
            ],
            out_specs=pl.BlockSpec((rt_s, hwt_s), lambda r, h: (r, h)),
        ),
        compiler_params=pltpu.CompilerParams(
            dimension_semantics=("parallel", "parallel"),
            vmem_limit_bytes=vmem_limit,
        ),
    )(x2, gate.reshape(R, 1))

    return out2.reshape(B, C, H, W)


def ca_layer_ref(x, w1, b1, alpha, w2, b2):
    """Pure-JAX reference mirroring the PyTorch forward."""
    y = jnp.mean(x, axis=(2, 3))                           # (B, C)
    h = y @ w1.T + b1                                      # (B, Cr)
    h = jnp.where(h >= 0, h, alpha * h)                    # PReLU
    s = h @ w2.T + b2                                      # (B, C)
    s = jax.nn.sigmoid(s)
    return x * s[:, :, None, None]


if __name__ == "__main__":
    B, C, H, W = 2, 4, 16, 16
    reduction = 2
    Cr = C // reduction

    key = jax.random.PRNGKey(0)
    kx, kw1, kb1, kw2, kb2 = jax.random.split(key, 5)

    x = jax.random.normal(kx, (B, C, H, W), dtype=jnp.float32)

    # Synthetic parameters (shapes match nn.Conv2d 1x1 weights).
    w1 = jax.random.normal(kw1, (Cr, C), dtype=jnp.float32) * 0.1   # conv1 weight (out, in)
    b1 = jax.random.normal(kb1, (Cr,), dtype=jnp.float32) * 0.1     # conv1 bias
    alpha = jnp.float32(0.25)                                       # nn.PReLU() default init
    w2 = jax.random.normal(kw2, (C, Cr), dtype=jnp.float32) * 0.1   # conv2 weight (out, in)
    b2 = jax.random.normal(kb2, (C,), dtype=jnp.float32) * 0.1      # conv2 bias

    out = ca_layer(x, w1, b1, alpha, w2, b2)
    out = jax.block_until_ready(out)

    ref = ca_layer_ref(x, w1, b1, alpha, w2, b2)
    assert out.shape == (B, C, H, W)
    assert jnp.allclose(out, ref, atol=1e-5, rtol=1e-5), "mismatch vs reference"

    print("KERNEL_OK")
</pallas_src>

<mosaic_0001>
module attributes {stable_mosaic.version = 11 : i64} {
  func.func @_pool_kernel(%arg0: i32, %arg1: i32, %arg2: memref<8x256xf32, #tpu.memory_space<vmem>>, %arg3: memref<8x1xf32, #tpu.memory_space<vmem>>, %arg4: memref<8x128xf32, #tpu.memory_space<vmem>>) attributes {dimension_semantics = [#tpu.dimension_semantics<parallel>, #tpu.dimension_semantics<arbitrary>], iteration_bounds = array<i64: 1, 1>, scalar_prefetch = 0 : i64, scratch_operands = 1 : i64, tpu.core_type = #tpu.core_type<tc>, window_params = [{transform_indices = @transform_0, window_bounds = array<i64: 8, 256>}, {transform_indices = @transform_1, window_bounds = array<i64: 8, 1>}]} {
    %c0_i32 = arith.constant 0 : i32
    %0 = arith.cmpi eq, %arg1, %c0_i32 : i32
    %1 = arith.extui %0 : i1 to i32
    %c0_i32_0 = arith.constant 0 : i32
    %2 = arith.cmpi ne, %1, %c0_i32_0 : i32
    scf.if %2 {
      %cst = arith.constant 0.000000e+00 : f32
      %12 = vector.broadcast %cst : f32 to vector<8x128xf32>
      %c0_9 = arith.constant 0 : index
      %c0_10 = arith.constant 0 : index
      %13 = vector.load %arg4[%c0_9, %c0_10] : memref<8x128xf32, #tpu.memory_space<vmem>>, vector<8x128xf32>
      tpu.vector_store %arg4[%c0_9, %c0_10], %12 {strides = array<i32>} : memref<8x128xf32, #tpu.memory_space<vmem>>, vector<8x128xf32>,
    } else {
    }
    %c0 = arith.constant 0 : index
    %c0_1 = arith.constant 0 : index
    %3 = vector.load %arg2[%c0, %c0_1] : memref<8x256xf32, #tpu.memory_space<vmem>>, vector<8x128xf32>
    %c0_2 = arith.constant 0 : index
    %c128 = arith.constant 128 : index
    %4 = vector.load %arg2[%c0_2, %c128] : memref<8x256xf32, #tpu.memory_space<vmem>>, vector<8x128xf32>
    %5 = arith.addf %3, %4 : vector<8x128xf32>
    %c0_3 = arith.constant 0 : index
    %c0_4 = arith.constant 0 : index
    %6 = vector.load %arg4[%c0_3, %c0_4] : memref<8x128xf32, #tpu.memory_space<vmem>>, vector<8x128xf32>
    %7 = arith.addf %6, %5 : vector<8x128xf32>
    %c0_5 = arith.constant 0 : index
    %c0_6 = arith.constant 0 : index
    %8 = vector.load %arg4[%c0_5, %c0_6] : memref<8x128xf32, #tpu.memory_space<vmem>>, vector<8x128xf32>
    tpu.vector_store %arg4[%c0_5, %c0_6], %7 {strides = array<i32>} : memref<8x128xf32, #tpu.memory_space<vmem>>, vector<8x128xf32>,
    %c0_i32_7 = arith.constant 0 : i32
    %9 = arith.cmpi eq, %arg1, %c0_i32_7 : i32
    %10 = arith.extui %9 : i1 to i32
    %c0_i32_8 = arith.constant 0 : i32
    %11 = arith.cmpi ne, %10, %c0_i32_8 : i32
    scf.if %11 {
      %c0_9 = arith.constant 0 : index
      %c0_10 = arith.constant 0 : index
      %12 = vector.load %arg4[%c0_9, %c0_10] : memref<8x128xf32, #tpu.memory_space<vmem>>, vector<8x128xf32>
      %cst = arith.constant dense<0.000000e+00> : vector<8xf32>
      %13 = vector.multi_reduction <add>, %12, %cst [1] : vector<8x128xf32> to vector<8xf32>
      %14 = vector.shape_cast %13 : vector<8xf32> to vector<8x1xf32>
      %cst_11 = arith.constant 3.906250e-03 : f32
      %15 = vector.broadcast %cst_11 : f32 to vector<8x1xf32>
      %16 = arith.mulf %14, %15 : vector<8x1xf32>
      %c0_12 = arith.constant 0 : index
      %c0_13 = arith.constant 0 : index
      %17 = vector.load %arg3[%c0_12, %c0_13] : memref<8x1xf32, #tpu.memory_space<vmem>>, vector<8x1xf32>
      tpu.vector_store %arg3[%c0_12, %c0_13], %16 {strides = array<i32>} : memref<8x1xf32, #tpu.memory_space<vmem>>, vector<8x1xf32>,
    } else {
    }
    return
  }
  func.func @transform_0(%arg0: i32, %arg1: i32) -> (i32, i32) {
    %c0_i32 = arith.constant 0 : i32
    return %arg0, %arg1 : i32, i32
  }
  func.func @transform_1(%arg0: i32, %arg1: i32) -> (i32, i32) {
    %c0_i32 = arith.constant 0 : i32
    %c0_i32_0 = arith.constant 0 : i32
    return %arg0, %c0_i32 : i32, i32
  }
}

</mosaic_0001>

<bundles_post_ra>
// kernel: tpu_custom_call.1
= control target key start
LH: loop header
LB: loop body
LE: loop exit
PB: predicated region body
PF: predicated region fallthrough
CT: control target
= control target key end

     0   :  { %6 = vsyncpa [#allocation4], 0  ;;  %s68_s6 = smov [#allocation3]   ;;  %s85_s0 = inlined_call_operand.hbm [shape: f32[8,256], index: 0, kind: input, shape index: {}]   ;;  %s86_s1 = inlined_call_operand.vmem [shape: f32[8,1], index: 1, kind: output, shape index: {}]  }
   0x1   :  { %s13_s7 = sshll.u32 %s68_s6, 4  ;;  %s14_s7 = int_to_ptr.vmem [resolvable:$true] %s13_s7 }
   0x2   :  { %s54_s8 = scalar_lea.vmem %s14_s7, 256  ;;  %p59_p1 = scmp.lt.s32.totalorder %s14_s7, %s14_s7 }
   0x3   :  { %p55_p0 = scmp.ne.s32.totalorder %s14_s7, %s54_s8  ;;  %p60_p2 = scmp.lt.s32.totalorder %s54_s8, %s54_s8 }
   0x5   :  { %p61_p3 = por %p60_p2, %p59_p1 }
   0x7   :  { %p62_p4 = pnand %p61_p3, %p55_p0 }
   0x9   :  { %65 = shalt.err (!%p62_p4)
}
   0xa   :  { %16 = dma.hbm_to_vmem [thread:$0]  %s85_s0, 256, %s14_s7, [#allocation4]  }
   0xb   :  { %66 = dma.done.wait [#allocation4], 256  }
   0xc   :  { %67 = vsyncadd [#allocation4], 4294967040  ;;  %v25_v0 = vld [vmem:[#allocation3] sm:$0xff]  ;;  %v26_v1 = vld [vmem:[#allocation3 + $0x8] sm:$0xff]  ;;  %vm38_vm0 = vcmask 7168  }
   0xd   :  { %v27_v2 = vadd.f32 %v26_v1, %v25_v0 }
   0xf   :  { %35 = vadd.xlane.f32.xlu0 %v27_v2 }
  0x98   :  { %v36_v3 = vpop.xlane.xlu0 %35 }
  0x99   :  { %v37_v4 = vmul.f32 0.00390625, %v36_v3 }
  0x9b   :  { %39 = vst.msk [vmem:[%s86_s1] sm:$0xff] %vm38_vm0, %v37_v4 }
  0x9c   :  { %44 = vsyncpa [#allocation4], 1 }

</bundles_post_ra>
